<compile_context>
chip_gen: v7x
topology: tpu7x:2x2x1
jax: 0.10.0
libtpu: 0.0.40
codegen_flags: <defaults>
</compile_context>

<pallas_src>
import jax
import jax.numpy as jnp
from jax.experimental import pallas as pl
from jax.experimental.pallas import tpu as pltpu


_PALLAS_MIN_BYTES = 1 * 1024 * 1024        # below this, XLA's roll wins (launch overhead)
_VMEM_RESIDENT_BUDGET = 12 * 1024 * 1024   # total resident VMEM (all double-buffered blocks)
_MAX_TILE_ROWS = 128                       # batch-tile cap; multiple of 8/16/32 sublanes
_PIPELINE_STEPS = 4                        # desired grid depth for pipelining
_PIPELINE_MIN_BYTES = 4 * 1024 * 1024      # only force time tiling above this size


def _native_sublanes(dtype) -> int:
    """Native sublane count: 8 for 32-bit, 16 for 16-bit, 32 for 8-bit dtypes."""
    return max(8, 8 * (4 // jnp.dtype(dtype).itemsize))


def _choose_time_tile(T: int, max_tt: int, min_time_steps: int):
    """Largest 128-aligned divisor of T that fits `max_tt` elements, preferring
    one that yields at least `min_time_steps` time tiles.  Returns T itself when
    no tiling is needed/possible but the whole row fits, else None."""
    if T % 128 != 0:
        return T if T <= max_tt else None
    q = T // 128
    limit = max_tt // 128
    if limit < 1:
        return None
    cands = set()
    d = 1
    while d * d <= q:
        if q % d == 0:
            if d <= limit:
                cands.add(d)
            if q // d <= limit:
                cands.add(q // d)
        d += 1
    if not cands:
        return T if T <= max_tt else None
    for c in sorted(cands, reverse=True):
        if q // c >= min_time_steps:
            return 128 * c
    return 128 * max(cands)


def _whole_row_kernel(T: int, m: int):
    """Single time block per tile: two disjoint sliced stores, no intermediate copy."""
    def kernel(x_ref, o_ref):
        o_ref[:, m:] = x_ref[:, : T - m]
        o_ref[:, :m] = x_ref[:, T - m:]
    return kernel


def _block_permute_kernel(x_ref, o_ref):
    """Shift is a multiple of the time tile: pure block permutation (plain copy)."""
    o_ref[...] = x_ref[...]


def _two_block_kernel(tt: int, r: int, s_cols: int):
    """General wrapping tile: out[:, :r] from the tail strip of the preceding
    block, out[:, r:] from the current block."""
    def kernel(strip_ref, cur_ref, o_ref):
        o_ref[:, :r] = strip_ref[:, s_cols - r:]
        o_ref[:, r:] = cur_ref[:, : tt - r]
    return kernel


def time_shift_pallas(audio: jax.Array, shift_length: int, *,
                      force_pallas=None, max_tile_bytes=None) -> jax.Array:
    """Circular time shift of `audio` (B, T) by +shift_length along the time axis."""
    if audio.ndim != 2:
        raise ValueError(f"expected (batch, time) audio, got shape {audio.shape}")
    B, T = audio.shape

    # PyTorch slicing semantics: shift == 0 or |shift| >= T is the identity.
    if shift_length == 0 or abs(shift_length) >= T:
        return audio
    m = shift_length % T                     # positive circular shift, 0 < m < T

    itemsize = jnp.dtype(audio.dtype).itemsize
    nbytes = B * T * itemsize
    use_pallas = (nbytes >= _PALLAS_MIN_BYTES) if force_pallas is None else force_pallas
    if not use_pallas:
        return jnp.roll(audio, m, axis=1)    # tiny inputs: launch overhead dominates

    # ---- tiling -----------------------------------------------------------
    sub = _native_sublanes(audio.dtype)
    if B <= _MAX_TILE_ROWS:
        tb = B                                           # full batch per tile
    else:
        tb = max(sub, (_MAX_TILE_ROWS // sub) * sub)     # sublane-native rows
    nB = -(-B // tb)

    # Resident VMEM ~= 2 buffers per spec (double buffering) x (<=2 in + 1 out).
    per_buffer = (_VMEM_RESIDENT_BUDGET // 6) if max_tile_bytes is None else max_tile_bytes
    max_tt = per_buffer // (tb * itemsize)
    if max_tt < 128:
        return jnp.roll(audio, m, axis=1)

    # Ask for a few time steps when the batch axis alone would give a
    # degenerate (1-2 step) grid: restores pipelining + v7x megacore split.
    if nbytes >= _PIPELINE_MIN_BYTES and nB < _PIPELINE_STEPS:
        min_time_steps = max(2, _PIPELINE_STEPS // nB)
    else:
        min_time_steps = 1

    tt = _choose_time_tile(T, max_tt, min_time_steps)
    if tt is None:
        # Huge non-128-multiple rows: no lane-aligned time tile fits the budget.
        # TODO(synk): DMA-only HBM->HBM variant (strided make_async_copy) here.
        return jnp.roll(audio, m, axis=1)

    nT = T // tt
    a, r = divmod(m, tt)
    grid = (nB, nT)
    out_spec = pl.BlockSpec((tb, tt), lambda i, j: (i, j))
    out_shape = jax.ShapeDtypeStruct((B, T), audio.dtype)
    params = pltpu.CompilerParams(dimension_semantics=("parallel", "parallel"))

    if nT == 1:
        return pl.pallas_call(
            _whole_row_kernel(T, m),
            out_shape=out_shape, grid=grid,
            in_specs=[pl.BlockSpec((tb, T), lambda i, j: (i, 0))],
            out_specs=out_spec, compiler_params=params,
        )(audio)

    if r == 0:
        off = nT - a                                     # 1 <= a <= nT - 1
        return pl.pallas_call(
            _block_permute_kernel,
            out_shape=out_shape, grid=grid,
            in_specs=[pl.BlockSpec((tb, tt), lambda i, j: (i, (j + off) % nT))],
            out_specs=out_spec, compiler_params=params,
        )(audio)

    # General case: each output tile straddles two input blocks.  Fetch the big
    # aligned part as a (tb, tt) block and only a narrow 128-aligned strip from
    # the end of the preceding block (duplicated input read ~r cols, not tt).
    k = tt // 128
    d = next(d for d in range(1, k + 1) if k % d == 0 and 128 * d >= r)
    s_cols = 128 * d
    strips_per_tile = tt // s_cols
    cur_off = (nT - a) % nT
    prev_off = nT - a - 1

    def strip_map(i, j):
        return (i, ((j + prev_off) % nT) * strips_per_tile + (strips_per_tile - 1))

    def cur_map(i, j):
        return (i, (j + cur_off) % nT)

    return pl.pallas_call(
        _two_block_kernel(tt, r, s_cols),
        out_shape=out_shape, grid=grid,
        in_specs=[pl.BlockSpec((tb, s_cols), strip_map),
                  pl.BlockSpec((tb, tt), cur_map)],
        out_specs=out_spec, compiler_params=params,
    )(audio, audio)


class TS:
    """JAX/Pallas port of the PyTorch TS noise layer (circular time shift)."""

    def __init__(self, length: int = 50):
        self.shift_length = length

    def __call__(self, rec_audio: jax.Array) -> jax.Array:
        return time_shift_pallas(rec_audio, self.shift_length)


if __name__ == "__main__":
    key = jax.random.PRNGKey(0)
    k1, k2, k3, k4, k5 = jax.random.split(key, 5)
    ts = TS(length=50)

    def check(got, want, name):
        assert got.shape == want.shape and got.dtype == want.dtype, name
        assert bool(jnp.array_equal(got, want)), f"{name}: mismatch vs reference"

    # 1) whole-row kernel (single time block), lane-aligned T.
    a1 = jax.random.normal(k1, (8, 1024), dtype=jnp.float32)
    o1 = jax.block_until_ready(time_shift_pallas(a1, 50, force_pallas=True))
    check(o1, jnp.roll(a1, 50, axis=1), "whole-row kernel")

    # 2) time-tiled wrapping kernel (strip + current block), r != 0.
    o2 = jax.block_until_ready(
        time_shift_pallas(a1, 50, force_pallas=True, max_tile_bytes=8 * 256 * 4))
    check(o2, jnp.roll(a1, 50, axis=1), "time-tiled wrapping kernel")

    # 3) pure block-permute kernel (shift is a multiple of the time tile).
    o3 = jax.block_until_ready(
        time_shift_pallas(a1, 256, force_pallas=True, max_tile_bytes=8 * 128 * 4))
    check(o3, jnp.roll(a1, 256, axis=1), "block-permute kernel")

    # 4) bf16, time-tiled wrapping kernel (dtype-aware sublane handling).
    a4 = jax.random.normal(k2, (4, 384), dtype=jnp.bfloat16)
    o4 = jax.block_until_ready(
        time_shift_pallas(a4, 50, force_pallas=True, max_tile_bytes=4 * 128 * 2))
    check(o4, jnp.roll(a4, 50, axis=1), "bf16 time-tiled kernel")

    # 5) T not a multiple of 128 (whole-row kernel, full-extent last dim).
    a5 = jax.random.normal(k3, (8, 300), dtype=jnp.float32)
    o5 = jax.block_until_ready(time_shift_pallas(a5, 50, force_pallas=True))
    check(o5, jnp.roll(a5, 50, axis=1), "non-128-aligned whole-row kernel")

    # 6) tiny input through the module interface: auto path uses XLA roll.
    a6 = jax.random.normal(k4, (2, 256), dtype=jnp.float32)
    o6 = jax.block_until_ready(ts(a6))
    check(o6, jnp.roll(a6, 50, axis=1), "tiny-input XLA fallback")

    # 7) |shift| >= T clamps to identity (matches the PyTorch slicing semantics).
    a7 = jax.random.normal(k5, (2, 32), dtype=jnp.float32)
    o7 = jax.block_until_ready(time_shift_pallas(a7, 50))
    check(o7, a7, "identity clamp (|shift| >= T)")

    print("KERNEL_OK")
</pallas_src>

<mosaic_0001>
module attributes {stable_mosaic.version = 11 : i64} {
  func.func @kernel(%arg0: i32, %arg1: i32, %arg2: memref<8x1024xf32, #tpu.memory_space<vmem>>, %arg3: memref<8x1024xf32, #tpu.memory_space<vmem>>) attributes {dimension_semantics = [#tpu.dimension_semantics<parallel>, #tpu.dimension_semantics<parallel>], iteration_bounds = array<i64: 1, 1>, scalar_prefetch = 0 : i64, scratch_operands = 0 : i64, tpu.core_type = #tpu.core_type<tc>, window_params = [{transform_indices = @transform_0, window_bounds = array<i64: 8, 1024>}, {transform_indices = @transform_1, window_bounds = array<i64: 8, 1024>}]} {
    %c0 = arith.constant 0 : index
    %c0_0 = arith.constant 0 : index
    %0 = vector.load %arg2[%c0, %c0_0] : memref<8x1024xf32, #tpu.memory_space<vmem>>, vector<8x974xf32>
    %c0_1 = arith.constant 0 : index
    %c50 = arith.constant 50 : index
    %1 = vector.load %arg3[%c0_1, %c50] : memref<8x1024xf32, #tpu.memory_space<vmem>>, vector<8x974xf32>
    tpu.vector_store %arg3[%c0_1, %c50], %0 {strides = array<i32>} : memref<8x1024xf32, #tpu.memory_space<vmem>>, vector<8x974xf32>,
    %c0_2 = arith.constant 0 : index
    %c974 = arith.constant 974 : index
    %2 = vector.load %arg2[%c0_2, %c974] : memref<8x1024xf32, #tpu.memory_space<vmem>>, vector<8x50xf32>
    %c0_3 = arith.constant 0 : index
    %c0_4 = arith.constant 0 : index
    %3 = vector.load %arg3[%c0_3, %c0_4] : memref<8x1024xf32, #tpu.memory_space<vmem>>, vector<8x50xf32>
    tpu.vector_store %arg3[%c0_3, %c0_4], %2 {strides = array<i32>} : memref<8x1024xf32, #tpu.memory_space<vmem>>, vector<8x50xf32>,
    return
  }
  func.func @transform_0(%arg0: i32, %arg1: i32) -> (i32, i32) {
    %c0_i32 = arith.constant 0 : i32
    %c0_i32_0 = arith.constant 0 : i32
    return %arg0, %c0_i32 : i32, i32
  }
  func.func @transform_1(%arg0: i32, %arg1: i32) -> (i32, i32) {
    %c0_i32 = arith.constant 0 : i32
    return %arg0, %arg1 : i32, i32
  }
}

</mosaic_0001>

<bundles_post_ra>
// kernel: tpu_custom_call.1
= control target key start
LH: loop header
LB: loop body
LE: loop exit
PB: predicated region body
PF: predicated region fallthrough
CT: control target
= control target key end

     0   :  { %6 = vsyncpa [#allocation3], 0  ;;  %s195_s0 = inlined_call_operand.hbm [shape: f32[8,1024], index: 0, kind: input, shape index: {}]   ;;  %s196_s1 = inlined_call_operand.hbm [shape: f32[8,1024], index: 1, kind: output, shape index: {}]  }
   0x1   :  { %7 = vsyncpa [#allocation4], 0  ;;  %s150_s6 = smov [#allocation2]   ;;  %s102_s10 = scalar_lea.hbm %s195_s0, 1024 }
   0x2   :  { %s14_s7 = sshll.u32 %s150_s6, 4  ;;  %p103_p0 = scmp.ne.s32.totalorder %s195_s0, %s102_s10  ;;  %s15_s7 = int_to_ptr.vmem [resolvable:$true] %s14_s7 }
   0x3   :  { %p106_p1 = scmp.lt.u32.totalorder %s102_s10, %s195_s0 }
   0x5   :  { %p108_p2 = pnand %p106_p1, %p103_p0 }
   0x7   :  { %111 = shalt.err (!%p108_p2)
}
   0x8   :  { %s112_s15 = scalar_lea.vmem %s15_s7, 1024  ;;  %p117_p4 = scmp.lt.s32.totalorder %s15_s7, %s15_s7 }
   0x9   :  { %p113_p3 = scmp.ne.s32.totalorder %s15_s7, %s112_s15  ;;  %p118_p5 = scmp.lt.s32.totalorder %s112_s15, %s112_s15 }
   0xb   :  { %p119_p6 = por %p118_p5, %p117_p4 }
   0xd   :  { %p120_p7 = pnand %p119_p6, %p113_p3 }
   0xf   :  { %123 = shalt.err (!%p120_p7)
}
  0x10   :  { %17 = dma.hbm_to_vmem [thread:$0]  %s195_s0, 1024, %s15_s7, [#allocation3]  }
  0x11   :  { %146 = dma.done.wait [#allocation3], 1024  }
  0x12   :  { %147 = vsyncadd [#allocation3], 4294966272  ;;  %v23_v0 = vld [vmem:[#allocation2 + $0x10] sm:$0xff]  ;;  %v21_v1 = vld [vmem:[#allocation2] sm:$0xff]  ;;  %s151_s18 = smov 50   ;;  %vm69_vm0 = vcmask 1047952  }
  0x13   :  { %41 = vrot.lane.b32.xlu1 %v23_v0, %s151_s18  ;;  %37 = vrot.lane.b32.xlu0 %v21_v1, %s151_s18  ;;  %v24_v2 = vld [vmem:[#allocation2 + $0x18] sm:$0xff]  ;;  %v22_v3 = vld [vmem:[#allocation2 + $0x8] sm:$0xff]  ;;  %v25_v5 = vld [vmem:[#allocation2 + $0x20] sm:$0xff]  ;;  %vm53_vm1 = vcmask 408576   ;;  %s152_s0 = smov [#allocation5]  }
  0x14   :  { %v26_v4 = vld [vmem:[#allocation2 + $0x28] sm:$0xff]  ;;  %v28_v6 = vld [vmem:[#allocation2 + $0x38] sm:$0xff]  ;;  %v27_v7 = vld [vmem:[#allocation2 + $0x30] sm:$0xff]  ;;  %s90_s19 = sshll.u32 %s152_s0, 4  ;;  %s91_s19 = int_to_ptr.vmem [resolvable:$true] %s90_s19 }
  0x15   :  { %s124_s20 = scalar_lea.vmem %s91_s19, 1024  ;;  %p129_p9 = scmp.lt.s32.totalorder %s91_s19, %s91_s19 }
  0x16   :  { %p125_p8 = scmp.ne.s32.totalorder %s91_s19, %s124_s20  ;;  %p130_p10 = scmp.lt.s32.totalorder %s124_s20, %s124_s20 }
  0x17   :  { %43 = vrot.lane.b32.xlu1 %v24_v2, %s151_s18  ;;  %39 = vrot.lane.b32.xlu0 %v22_v3, %s151_s18 }
  0x18   :  { %p131_p11 = por %p130_p10, %p129_p9 }
  0x1a   :  { %p132_p12 = pnand %p131_p11, %p125_p8 }
  0x1b   :  { %47 = vrot.lane.b32.xlu1 %v26_v4, %s151_s18  ;;  %45 = vrot.lane.b32.xlu0 %v25_v5, %s151_s18 }
  0x1f   :  { %51 = vrot.lane.b32.xlu1 %v28_v6, %s151_s18  ;;  %49 = vrot.lane.b32.xlu0 %v27_v7, %s151_s18 }
  0x23   :  { %80 = vrot.lane.b32.xlu0 %v28_v6, %s151_s18 }
  0x85   :  { %v42_v8 = vpop.permute.xlu1 %41  ;;  %v38_v9 = vpop.permute.xlu0 %37 }
  0x86   :  { %70 = vst.msk [vmem:[#allocation5] sm:$0xff] %vm69_vm0, %v38_v9 }
  0x89   :  { %v44_v10 = vpop.permute.xlu1 %43  ;;  %v40_v11 = vpop.permute.xlu0 %39 }
  0x8a   :  { %v56_v12 = vsel %vm53_vm1, %v42_v8, %v44_v10  ;;  %v54_v13 = vsel %vm53_vm1, %v38_v9, %v40_v11  ;;  %v55_v14 = vsel %vm53_vm1, %v40_v11, %v42_v8 }
  0x8b   :  { %73 = vst [vmem:[#allocation5 + $0x18] sm:$0xff] %v56_v12  ;;  %71 = vst [vmem:[#allocation5 + $0x8] sm:$0xff] %v54_v13 }
  0x8c   :  { %72 = vst [vmem:[#allocation5 + $0x10] sm:$0xff] %v55_v14 }
  0x8d   :  { %v48_v15 = vpop.permute.xlu1 %47  ;;  %v46_v16 = vpop.permute.xlu0 %45 }
  0x8e   :  { %v57_v17 = vsel %vm53_vm1, %v44_v10, %v46_v16  ;;  %v58_v18 = vsel %vm53_vm1, %v46_v16, %v48_v15 }
  0x8f   :  { %74 = vst [vmem:[#allocation5 + $0x20] sm:$0xff] %v57_v17  ;;  %75 = vst [vmem:[#allocation5 + $0x28] sm:$0xff] %v58_v18 }
  0x91   :  { %v52_v19 = vpop.permute.xlu1 %51  ;;  %v50_v20 = vpop.permute.xlu0 %49 }
  0x92   :  { %v59_v21 = vsel %vm53_vm1, %v48_v15, %v50_v20  ;;  %v60_v22 = vsel %vm53_vm1, %v50_v20, %v52_v19 }
  0x93   :  { %76 = vst [vmem:[#allocation5 + $0x30] sm:$0xff] %v59_v21  ;;  %77 = vst [vmem:[#allocation5 + $0x38] sm:$0xff] %v60_v22 }
  0x95   :  { %v81_v23 = vpop.permute.xlu0 %80 }
  0x96   :  { %83 = vst.msk [vmem:[#allocation5] sm:$0xff] %vm53_vm1, %v81_v23 }
  0x97   :  { %135 = shalt.err (!%p132_p12)
}
  0x98   :  { %s136_s23 = scalar_lea.hbm %s196_s1, 1024 }
  0x99   :  { %p137_p13 = scmp.ne.s32.totalorder %s196_s1, %s136_s23  ;;  %p140_p0 = scmp.lt.u32.totalorder %s136_s23, %s196_s1 }
  0x9b   :  { %p142_p1 = pnand %p140_p0, %p137_p13 }
  0x9d   :  { %145 = shalt.err (!%p142_p1)
}
  0x9e   :  { %93 = dma.vmem_to_hbm [thread:$0]  %s91_s19, 1024, %s196_s1, [#allocation4]  }
  0x9f   :  { %148 = dma.done.wait [#allocation4], 1024  }
  0xa0   :  { %149 = vsyncadd [#allocation4], 4294966272 }
  0xa1   :  { %97 = vsyncpa [#allocation3], 1 }
  0xa2   :  { %98 = vsyncpa [#allocation4], 1 }

</bundles_post_ra>
